<compile_context>
chip_gen: v5e
topology: v5e:2x2
jax: 0.10.0
libtpu: 0.0.40
codegen_flags: <defaults>
</compile_context>

<pallas_src>
import jax
import jax.numpy as jnp
from jax import lax
from jax.experimental import pallas as pl
from jax.experimental.pallas import tpu as pltpu


def _linear_aligner_kernel(x_ref, w_ref, b_ref, o_ref):
    # x_ref: (tm, Din); w_ref: (Dout_pad, Din) [PyTorch layout]; b_ref: (1, Dout_pad)
    # Contract over Din of both operands -> (tm, Dout_pad); no transpose needed.
    acc = lax.dot_general(
        x_ref[...],
        w_ref[...],
        dimension_numbers=(((1,), (1,)), ((), ())),
        preferred_element_type=jnp.float32,   # f32 accumulation even for bf16 inputs
    )
    acc = acc + b_ref[...].astype(jnp.float32)   # (1, Dout_pad) broadcasts over rows
    acc = jnp.clip(acc, -0.3, 0.3)               # clamp in f32 before the final cast
    o_ref[...] = acc.astype(o_ref.dtype)


def _round_up(n, m):
    return ((n + m - 1) // m) * m


def _resident_spec(shape):
    """BlockSpec for a grid-invariant operand pinned to block (0, ...).

    Constant index map => double-buffering is pointless; request a single
    buffer to halve the resident VMEM (matters for wide W on v7x's 64 MiB).
    """
    idx = lambda i: (0,) * len(shape)
    try:
        return pl.BlockSpec(shape, idx, pipeline_mode=pl.Buffered(1))
    except TypeError:  # older jax without the pipeline_mode kwarg
        return pl.BlockSpec(shape, idx)


def linear_aligner(x, weight, bias, *, block_b=1024, compute_dtype=jnp.bfloat16,
                   out_dtype=None):
    """x: (B, Din); weight: (Dout, Din) [PyTorch layout]; bias: (Dout,)."""
    B, Din = x.shape
    Dout = weight.shape[0]
    out_dtype = x.dtype if out_dtype is None else out_dtype

    # bf16 operands (MXU-native) unless disabled; accumulation stays f32.
    if compute_dtype is not None:
        x = x.astype(compute_dtype)
        weight = weight.astype(compute_dtype)

    # Lane-dense output: pad Dout to a multiple of 128. Pads only W/bias (one
    # small pass, reused across all batch tiles) — never x.
    Dout_pad = _round_up(Dout, 128)
    if Dout_pad != Dout:
        weight = jnp.pad(weight, ((0, Dout_pad - Dout), (0, 0)))
        bias = jnp.pad(bias, (0, Dout_pad - Dout))
    b2d = bias.reshape(1, Dout_pad).astype(jnp.float32)

    # Batch tile: multiple of 8 (f32 sublanes), capped by block_b, and sized so
    # moderate batches give >= 2 grid steps (v7x: shard over both TensorCores).
    # The last (ragged) block is handled by Pallas: padded reads, masked writes.
    tm = min(block_b, _round_up(max(pl.cdiv(B, 2), 1), 8))
    grid_b = pl.cdiv(B, tm)

    # Explicit scoped-VMEM budget (v5e default is only 16 MiB): double-buffered
    # x/out tiles + single-buffered W/bias, with headroom; clamp to 64 MiB.
    footprint = (2 * tm * Din * jnp.dtype(x.dtype).itemsize
                 + 2 * tm * Dout_pad * jnp.dtype(out_dtype).itemsize
                 + Dout_pad * Din * jnp.dtype(weight.dtype).itemsize
                 + Dout_pad * 4)
    vmem_limit = int(min(max(32 << 20, footprint * 5 // 4 + (1 << 20)), 64 << 20))

    out = pl.pallas_call(
        _linear_aligner_kernel,
        out_shape=jax.ShapeDtypeStruct((B, Dout_pad), out_dtype),
        grid=(grid_b,),
        in_specs=[
            pl.BlockSpec((tm, Din), lambda i: (i, 0)),   # x: tiled over batch
            _resident_spec((Dout_pad, Din)),             # W: VMEM-resident, 1 buffer
            _resident_spec((1, Dout_pad)),               # bias: VMEM-resident, 1 buffer
        ],
        out_specs=pl.BlockSpec((tm, Dout_pad), lambda i: (i, 0)),
        compiler_params=pltpu.CompilerParams(
            dimension_semantics=("parallel",),           # batch axis: no accumulator
            vmem_limit_bytes=vmem_limit,
        ),
    )(x, weight, b2d)

    if Dout_pad != Dout:
        out = out[:, :Dout]
    return out


if __name__ == "__main__":
    key = jax.random.PRNGKey(0)

    # --- Small shapes consistent with the module's forward -----------------
    B, CLIP_DIM, CLAP_DIM = 8, 32, 16
    kx, kw, kb, k2 = jax.random.split(key, 4)

    x = jax.random.normal(kx, (B, CLIP_DIM), dtype=jnp.float32)
    # Deterministic init mimicking nn.Linear default (uniform +-1/sqrt(fan_in)).
    bound = 1.0 / (CLIP_DIM ** 0.5)
    weight = jax.random.uniform(kw, (CLAP_DIM, CLIP_DIM), minval=-bound,
                                maxval=bound, dtype=jnp.float32)
    bias = jax.random.uniform(kb, (CLAP_DIM,), minval=-bound,
                              maxval=bound, dtype=jnp.float32)

    ref = jnp.clip(x @ weight.T + bias, -0.3, 0.3)

    # bf16-operand path (default): f32 accumulation, relaxed tolerance.
    out = jax.block_until_ready(linear_aligner(x, weight, bias))
    assert out.shape == (B, CLAP_DIM)
    assert out.dtype == x.dtype
    assert jnp.allclose(out, ref, atol=2e-2), "mismatch vs f32 reference (bf16 path)"

    # f32 path (module-exact semantics), tighter tolerance.
    out_f32 = jax.block_until_ready(linear_aligner(x, weight, bias, compute_dtype=None))
    assert jnp.allclose(out_f32, ref, atol=1e-4), "mismatch vs f32 reference (f32 path)"

    # --- Larger ragged batch: multi-step grid + partial last block ----------
    B2, D_IN2, D_OUT2 = 100, 256, 128
    kx2, kw2, kb2 = jax.random.split(k2, 3)
    x2 = jax.random.normal(kx2, (B2, D_IN2), dtype=jnp.float32)
    bound2 = 1.0 / (D_IN2 ** 0.5)
    w2 = jax.random.uniform(kw2, (D_OUT2, D_IN2), minval=-bound2,
                            maxval=bound2, dtype=jnp.float32)
    b2 = jax.random.uniform(kb2, (D_OUT2,), minval=-bound2,
                            maxval=bound2, dtype=jnp.float32)

    out2 = jax.block_until_ready(linear_aligner(x2, w2, b2, block_b=64))
    ref2 = jnp.clip(x2 @ w2.T + b2, -0.3, 0.3)
    assert out2.shape == (B2, D_OUT2)
    assert jnp.allclose(out2, ref2, atol=2e-2), "mismatch vs f32 reference (tiled)"

    print("KERNEL_OK")
</pallas_src>

<mosaic_0001>
module attributes {stable_mosaic.version = 11 : i64} {
  func.func @_linear_aligner_kernel(%arg0: i32, %arg1: memref<8x32xbf16, #tpu.memory_space<vmem>>, %arg2: memref<128x32xbf16, #tpu.memory_space<vmem>>, %arg3: memref<1x128xf32, #tpu.memory_space<vmem>>, %arg4: memref<8x128xf32, #tpu.memory_space<vmem>>) attributes {dimension_semantics = [#tpu.dimension_semantics<parallel>], iteration_bounds = array<i64: 1>, scalar_prefetch = 0 : i64, scratch_operands = 0 : i64, tpu.core_type = #tpu.core_type<tc>, window_params = [{transform_indices = @transform_0, window_bounds = array<i64: 8, 32>}, {pipeline_mode = #tpu.pipeline_mode<synchronous>, transform_indices = @transform_1, window_bounds = array<i64: 128, 32>}, {pipeline_mode = #tpu.pipeline_mode<synchronous>, transform_indices = @transform_2, window_bounds = array<i64: 1, 128>}, {transform_indices = @transform_3, window_bounds = array<i64: 8, 128>}]} {
    %c0 = arith.constant 0 : index
    %c0_0 = arith.constant 0 : index
    %0 = vector.load %arg1[%c0, %c0_0] : memref<8x32xbf16, #tpu.memory_space<vmem>>, vector<8x32xbf16>
    %c0_1 = arith.constant 0 : index
    %c0_2 = arith.constant 0 : index
    %1 = vector.load %arg2[%c0_1, %c0_2] : memref<128x32xbf16, #tpu.memory_space<vmem>>, vector<128x32xbf16>
    %cst = arith.constant dense<0.000000e+00> : vector<8x128xf32>
    %2 = tpu.matmul %0, %1, %cst {dimension_numbers = #tpu.dot_dimension_numbers<[1], [1], [0], [0], [0, 0, 1, 0], [], []>} : vector<8x32xbf16>, vector<128x32xbf16>, vector<8x128xf32> -> vector<8x128xf32>
    %c0_3 = arith.constant 0 : index
    %c0_4 = arith.constant 0 : index
    %3 = vector.load %arg3[%c0_3, %c0_4] : memref<1x128xf32, #tpu.memory_space<vmem>>, vector<1x128xf32>
    %4 = vector.broadcast %3 : vector<1x128xf32> to vector<8x128xf32>
    %5 = arith.addf %2, %4 : vector<8x128xf32>
    %cst_5 = arith.constant -3.000000e-01 : f32
    %cst_6 = arith.constant 3.000000e-01 : f32
    %6 = vector.broadcast %cst_5 : f32 to vector<8x128xf32>
    %7 = arith.maximumf %6, %5 : vector<8x128xf32>
    %8 = vector.broadcast %cst_6 : f32 to vector<8x128xf32>
    %9 = arith.minimumf %8, %7 : vector<8x128xf32>
    %c0_7 = arith.constant 0 : index
    %c0_8 = arith.constant 0 : index
    %10 = vector.load %arg4[%c0_7, %c0_8] : memref<8x128xf32, #tpu.memory_space<vmem>>, vector<8x128xf32>
    tpu.vector_store %arg4[%c0_7, %c0_8], %9 {strides = array<i32>} : memref<8x128xf32, #tpu.memory_space<vmem>>, vector<8x128xf32>,
    return
  }
  func.func @transform_0(%arg0: i32) -> (i32, i32) {
    %c0_i32 = arith.constant 0 : i32
    %c0_i32_0 = arith.constant 0 : i32
    return %arg0, %c0_i32 : i32, i32
  }
  func.func @transform_1(%arg0: i32) -> (i32, i32) {
    %c0_i32 = arith.constant 0 : i32
    %c0_i32_0 = arith.constant 0 : i32
    %c0_i32_1 = arith.constant 0 : i32
    return %c0_i32, %c0_i32_0 : i32, i32
  }
  func.func @transform_2(%arg0: i32) -> (i32, i32) {
    %c0_i32 = arith.constant 0 : i32
    %c0_i32_0 = arith.constant 0 : i32
    %c0_i32_1 = arith.constant 0 : i32
    return %c0_i32, %c0_i32_0 : i32, i32
  }
  func.func @transform_3(%arg0: i32) -> (i32, i32) {
    %c0_i32 = arith.constant 0 : i32
    %c0_i32_0 = arith.constant 0 : i32
    return %arg0, %c0_i32 : i32, i32
  }
}

</mosaic_0001>

<bundles_post_ra>
// kernel: tpu_custom_call.1
= control target key start
LH: loop header
LB: loop body
LE: loop exit
PB: predicated region body
PF: predicated region fallthrough
CT: control target
= control target key end

     0   :  { %vm76_vm0 = vcmask 261120   ;;  %s269_s0 = inlined_call_operand.vmem [shape: bf16[8,32], index: 0, kind: input, shape index: {}]   ;;  %s270_s1 = inlined_call_operand.vmem [shape: bf16[128,32], index: 1, kind: input, shape index: {}]   ;;  %s271_s2 = inlined_call_operand.vmem [shape: f32[1,128], index: 2, kind: input, shape index: {}]   ;;  %s272_s3 = inlined_call_operand.hbm [shape: f32[8,128], index: 3, kind: output, shape index: {}]  }
   0x1   :  { %v177_v0 = vld [vmem:[%s270_s1 + $0x38] sm:$0xff] }
   0x2   :  { %v102_v1 = vsel %vm76_vm0, %v177_v0, 0 }
   0x3   :  { %8 = vsyncpa [#allocation3], 0  ;;  %104 = vmatpush.bf16.xpose.msra.mxu0 %v102_v1  ;;  %v176_v2 = vld [vmem:[%s270_s1 + $0x30] sm:$0xff]  ;;  %v175_v4 = vld [vmem:[%s270_s1 + $0x28] sm:$0xff]  ;;  %s206_s5 = smov [#allocation2]  }
   0x4   :  { %v99_v3 = vsel %vm76_vm0, %v176_v2, 0  ;;  %v96_v5 = vsel %vm76_vm0, %v175_v4, 0  ;;  %v174_v6 = vld [vmem:[%s270_s1 + $0x20] sm:$0xff]  ;;  %v173_v8 = vld [vmem:[%s270_s1 + $0x18] sm:$0xff]  ;;  %v172_v10 = vld [vmem:[%s270_s1 + $0x10] sm:$0xff]  ;;  %s125_s6 = sshll.u32 %s206_s5, 4  ;;  %s126_s6 = int_to_ptr.vmem [resolvable:$true] %s125_s6 }
   0x5   :  { %v93_v7 = vsel %vm76_vm0, %v174_v6, 0  ;;  %v90_v9 = vsel %vm76_vm0, %v173_v8, 0  ;;  %v87_v11 = vsel %vm76_vm0, %v172_v10, 0  ;;  %v171_v12 = vld [vmem:[%s270_s1 + $0x8] sm:$0xff]  ;;  %v170_v14 = vld [vmem:[%s270_s1] sm:$0xff]  ;;  %s127_s1 = sshll.u32 %s272_s3, 4  ;;  %s128_s1 = int_to_ptr.hbm [resolvable:$true] %s127_s1 }
   0x6   :  { %v84_v13 = vsel %vm76_vm0, %v171_v12, 0  ;;  %v81_v15 = vsel %vm76_vm0, %v170_v14, 0  ;;  %v15_v16 = vld [vmem:[%s269_s0] sm:$0xf] }
   0x7   :  { %v179_v17 = vld [vmem:[%s271_s2] ss:$0 sm:$0xff] }
   0xb   :  { %105 = vmatpush.bf16.xpose.msra.mxu0 %v99_v3 }
  0x13   :  { %106 = vmatpush.bf16.xpose.msra.mxu0 %v96_v5 }
  0x1b   :  { %107 = vmatpush.bf16.xpose.msra.mxu0 %v93_v7 }
  0x23   :  { %108 = vmatpush.bf16.xpose.msra.mxu0 %v90_v9 }
  0x2b   :  { %109 = vmatpush.bf16.xpose.msra.mxu0 %v87_v11 }
  0x33   :  { %110 = vmatpush.bf16.xpose.msra.mxu0 %v84_v13 }
  0x3b   :  { %111 = vmatpush.bf16.xpose.msra.mxu0 %v81_v15 }
  0x42   :  { %168 = vmatmul.msk.bf16.vlgmr.msra.gmra.mxu0 %vm76_vm0, %v15_v16 }
  0xbf   :  { %v113_v18 = vpop.f32.mrf.mxu0 }
  0xc0   :  { %v114_v19 = vadd.f32 %v179_v17, %v113_v18 }
  0xc2   :  { %v169_v20 = vclamps-f32 %v114_v19, 0.3 }
  0xc4   :  { %119 = vst [vmem:[#allocation2] sm:$0xff] %v169_v20 }
  0xc5   :  { %130 = dma.vmem_to_hbm [thread:$0]  %s126_s6, 128, %s128_s1, [#allocation3]  }
  0xc7   :  { %v115_v21 = vpop.f32.mrf.mxu0 }
  0xc8   :  { %204 = dma.done.wait [#allocation3], 128  }
  0xc9   :  { %205 = vsyncadd [#allocation3], 4294967168 }
  0xca   :  { %135 = vsyncpa [#allocation3], 1 }

</bundles_post_ra>
